<compile_context>
chip_gen: v5e
topology: v5e:2x2
jax: 0.10.0
libtpu: 0.0.40
codegen_flags: <defaults>
</compile_context>

<pallas_src>
import functools

import jax
import jax.numpy as jnp
from jax.experimental import pallas as pl
from jax.experimental.pallas import tpu as pltpu

BN_EPS = 1e-5


def _round_up(x, m):
    return ((x + m - 1) // m) * m


def _sublane_multiple(dtype):
    # f32 vreg tile is (8, 128); sub-32-bit dtypes pack 2x/4x along sublanes.
    return 8 * max(1, 4 // jnp.dtype(dtype).itemsize)


def _xdens_transition_kernel(x_ref, scale_ref, shift_ref, w_ref, o_ref, *,
                             compute_dtype, matmul_dtype):
    """One grid step = (batch element, tile of pooled output rows).

    x_ref     : (t_hp, 2, Wp, 2*Cin)  row-pair tile; the 2*Cin lanes hold
                                      [channels of even-w pixel | odd-w pixel]
    scale_ref : (1, 2*Cin)            folded BN scale, duplicated per w-phase
    shift_ref : (1, 2*Cin)            folded BN shift, duplicated per w-phase
    w_ref     : (Cin, Cout)           1x1 conv weight^T, pre-scaled by 0.25
    o_ref     : (t_hp, Wp, Cout)
    """
    sc = scale_ref[...].astype(compute_dtype)        # read once, (1, 2*Cin)
    sh = shift_ref[...].astype(compute_dtype)

    xb = x_ref[...]                                  # (t_hp, 2, Wp, 2*Cin)

    def bn_relu(v):                                  # v: (t_hp, Wp, 2*Cin)
        return jnp.maximum(v.astype(compute_dtype) * sc + sh, 0.0)

    # 2x2 sum-pool (the /4 is folded into the weight):
    #   H pair -> add of the two parity slices (middle dim, cheap),
    #   W pair -> add of two lane slices at offsets 0 and Cin.
    s = bn_relu(xb[:, 0]) + bn_relu(xb[:, 1])        # (t_hp, Wp, 2*Cin)
    cin = s.shape[-1] // 2
    pooled = s[..., :cin] + s[..., cin:]             # (t_hp, Wp, Cin)

    t_hp, wp, _ = pooled.shape
    p2 = pooled.astype(matmul_dtype).reshape(t_hp * wp, cin)
    # 1x1 conv == matmul over channels on the MXU, f32 accumulation.
    r = jnp.dot(p2, w_ref[...], preferred_element_type=jnp.float32)
    o_ref[...] = r.reshape(t_hp, wp, r.shape[-1]).astype(o_ref.dtype)


def xdens_transition_block_nhwc(x_nhwc, gamma, beta, running_mean, running_var,
                                conv_weight, *, matmul_dtype=None,
                                compute_dtype=jnp.float32,
                                vmem_budget_bytes=32 << 20):
    """Forward pass, channels-last (production path: no pre/post HBM passes).

    x_nhwc      : (N, H, W, Cin)
    gamma/beta/running_mean/running_var : (Cin,)
    conv_weight : (Cout, Cin, 1, 1)   (PyTorch Conv2d layout, no bias)
    returns     : (N, H//2, W//2, Cout), dtype of x_nhwc
    """
    N, H, W, Cin = x_nhwc.shape
    Cout = conv_weight.shape[0]
    assert conv_weight.shape[1] == Cin
    assert H % 2 == 0 and W % 2 == 0
    Hp, Wp = H // 2, W // 2

    out_dtype = x_nhwc.dtype
    if matmul_dtype is None:
        # bf16 activations -> bf16 MXU feed (f32 accumulation); f32 stays f32.
        matmul_dtype = (jnp.bfloat16 if x_nhwc.dtype == jnp.bfloat16
                        else jnp.float32)

    # ---- fold BN into scale/shift; fold the 0.25 pool factor into the weight
    # (ReLU sits between BN and the conv, so 0.25 cannot go into the BN scale).
    scale = gamma.astype(jnp.float32) * jax.lax.rsqrt(
        running_var.astype(jnp.float32) + BN_EPS)
    shift = beta.astype(jnp.float32) - running_mean.astype(jnp.float32) * scale
    # The kernel sees 2*Cin lanes = [even-w pixel channels | odd-w pixel channels].
    scale2 = jnp.tile(scale, 2)[None, :]             # (1, 2*Cin)
    shift2 = jnp.tile(shift, 2)[None, :]
    w = (conv_weight.reshape(Cout, Cin).T.astype(jnp.float32)
         * 0.25).astype(matmul_dtype)                # (Cin, Cout)

    # ---- free (row-major, layout-preserving) view of the activations.
    x5 = x_nhwc.reshape(N, Hp, 2, Wp, 2 * Cin)

    # ---- tile selection: largest row-pair tile t_hp (divisor of Hp) whose full
    # VMEM footprint fits the budget, while keeping >= min(8, N*Hp) grid steps so
    # both v7x TensorCores get work and the pipeline has steps to overlap.
    x_isz = jnp.dtype(x_nhwc.dtype).itemsize
    o_isz = jnp.dtype(out_dtype).itemsize
    w_isz = jnp.dtype(matmul_dtype).itemsize
    r2c = _round_up(2 * Cin, 128)
    rc = _round_up(Cin, 128)
    rco = _round_up(Cout, 128)
    in_row = 2 * _round_up(Wp, _sublane_multiple(x_nhwc.dtype)) * r2c * x_isz
    out_row = _round_up(Wp, _sublane_multiple(out_dtype)) * rco * o_isz
    # Rough estimate of f32 compute intermediates (post-BN half, H-sum, pooled,
    # matmul result), single-buffered.
    ir_row = _round_up(Wp, 8) * (2 * r2c + rc + rco) * 4
    # Weight / scale / shift budgeted at 2 buffers (conservative; they are
    # single-buffered via pl.Buffered(1) when the installed jax supports it).
    fixed = (2 * _round_up(Cin, _sublane_multiple(matmul_dtype)) * rco * w_isz
             + 2 * 2 * 8 * r2c * 4)

    def vmem_total(t):
        return t * (2 * in_row + 2 * out_row + ir_row) + fixed

    divisors = [d for d in range(1, Hp + 1) if Hp % d == 0]
    fitting = [d for d in divisors if vmem_total(d) <= vmem_budget_bytes] or [1]
    target_steps = min(8, N * Hp)
    cands = [d for d in fitting if N * (Hp // d) >= target_steps] or [fitting[0]]
    t_hp = max(cands)
    n_h = Hp // t_hp
    vmem_limit = int(vmem_total(t_hp)) + (16 << 20)   # real footprint + headroom

    kernel = functools.partial(_xdens_transition_kernel,
                               compute_dtype=compute_dtype,
                               matmul_dtype=matmul_dtype)

    def _call(single_buffer_invariants):
        inv_kwargs = {}
        if single_buffer_invariants:
            # Invariant operands (constant index map): fetch once, one buffer.
            inv_kwargs = dict(pipeline_mode=pl.Buffered(1))

        def inv_spec(shape):
            return pl.BlockSpec(shape, lambda n, h: (0, 0), **inv_kwargs)

        return pl.pallas_call(
            kernel,
            out_shape=jax.ShapeDtypeStruct((N, Hp, Wp, Cout), out_dtype),
            grid=(N, n_h),
            in_specs=[
                # None == squeezed batch dim -> kernel ref is (t_hp, 2, Wp, 2*Cin)
                pl.BlockSpec((None, t_hp, 2, Wp, 2 * Cin),
                             lambda n, h: (n, h, 0, 0, 0)),
                inv_spec((1, 2 * Cin)),
                inv_spec((1, 2 * Cin)),
                inv_spec((Cin, Cout)),
            ],
            out_specs=pl.BlockSpec((None, t_hp, Wp, Cout),
                                   lambda n, h: (n, h, 0, 0)),
            compiler_params=pltpu.CompilerParams(
                dimension_semantics=("parallel", "parallel"),
                vmem_limit_bytes=vmem_limit),
        )(x5, scale2, shift2, w)

    try:
        return _call(True)
    except Exception:
        # Graceful fallback for jax versions without BlockSpec(pipeline_mode=...)
        # / pl.Buffered: the invariant operands then use the default double
        # buffering (already accounted for in the VMEM budget above).
        return _call(False)


def xdens_transition_block_nchw(x_nchw, gamma, beta, running_mean, running_var,
                                conv_weight, **kwargs):
    """PyTorch-layout (NCHW) adapter matching XDensTransitionBlock.forward.

    The two transposes below are interface glue for the NCHW convention of the
    reference module only (each costs one HBM round trip).  In a channels-last
    model call xdens_transition_block_nhwc directly: the activations are then
    read and written exactly once with no layout pre/post-processing.
    """
    x_nhwc = jnp.transpose(x_nchw, (0, 2, 3, 1))
    y = xdens_transition_block_nhwc(x_nhwc, gamma, beta, running_mean,
                                    running_var, conv_weight, **kwargs)
    return jnp.transpose(y, (0, 3, 1, 2))


def _reference_nchw(x_nchw, gamma, beta, mean, var, conv_weight):
    """Pure-JAX reference mirroring the PyTorch forward (BN eval mode)."""
    inv_std = 1.0 / jnp.sqrt(var + BN_EPS)
    scale = (gamma * inv_std)[None, :, None, None]
    shift = (beta - mean * gamma * inv_std)[None, :, None, None]
    y = jnp.maximum(x_nchw * scale + shift, 0.0)
    w = conv_weight.reshape(conv_weight.shape[0], conv_weight.shape[1])
    z = jnp.einsum('ncHW,oc->noHW', y, w)            # 1x1 conv
    N, Co, H, W = z.shape
    return z.reshape(N, Co, H // 2, 2, W // 2, 2).mean(axis=(3, 5))


def _make_inputs(key, N, Cin, H, W, Cout):
    k_x, k_g, k_b, k_m, k_v, k_w = jax.random.split(key, 6)
    x = jax.random.normal(k_x, (N, Cin, H, W), dtype=jnp.float32)
    gamma = jax.random.normal(k_g, (Cin,), dtype=jnp.float32) * 0.1 + 1.0
    beta = jax.random.normal(k_b, (Cin,), dtype=jnp.float32) * 0.1
    mean = jax.random.normal(k_m, (Cin,), dtype=jnp.float32) * 0.1
    var = jnp.abs(jax.random.normal(k_v, (Cin,), dtype=jnp.float32)) + 0.5
    w = jax.random.normal(k_w, (Cout, Cin, 1, 1), dtype=jnp.float32) * 0.1
    return x, gamma, beta, mean, var, w


if __name__ == "__main__":
    key = jax.random.PRNGKey(0)
    k1, k2 = jax.random.split(key)

    # --- test 1: PyTorch NCHW signature (adapter), tiny shapes, f32 ---
    N, Cin, H, W, Cout = 2, 4, 16, 16, 8
    x, gamma, beta, mean, var, cw = _make_inputs(k1, N, Cin, H, W, Cout)
    out = xdens_transition_block_nchw(x, gamma, beta, mean, var, cw)
    out = jax.block_until_ready(out)
    ref = _reference_nchw(x, gamma, beta, mean, var, cw)
    assert out.shape == (N, Cout, H // 2, W // 2), out.shape
    assert jnp.allclose(out, ref, atol=1e-4, rtol=1e-4), \
        float(jnp.max(jnp.abs(out - ref)))

    # --- test 2: NHWC production path, lane-aligned channels, tiny VMEM budget
    #     to force a multi-tile grid (exercises the pipeline + index maps) ---
    N2, Cin2, H2, W2, Cout2 = 2, 64, 16, 16, 32
    x2, g2, b2, m2, v2, cw2 = _make_inputs(k2, N2, Cin2, H2, W2, Cout2)
    x2_nhwc = jnp.transpose(x2, (0, 2, 3, 1))        # test-input prep only
    out2 = xdens_transition_block_nhwc(x2_nhwc, g2, b2, m2, v2, cw2,
                                       vmem_budget_bytes=200_000)
    out2 = jax.block_until_ready(out2)
    ref2 = jnp.transpose(_reference_nchw(x2, g2, b2, m2, v2, cw2), (0, 2, 3, 1))
    assert out2.shape == (N2, H2 // 2, W2 // 2, Cout2), out2.shape
    assert jnp.allclose(out2, ref2, atol=1e-4, rtol=1e-4), \
        float(jnp.max(jnp.abs(out2 - ref2)))

    # --- test 3: bf16 end-to-end (bf16 HBM stream, bf16 VPU math on v6e/v7x,
    #     bf16 MXU feed with f32 accumulation) — loose tolerance ---
    out3 = xdens_transition_block_nhwc(x2_nhwc.astype(jnp.bfloat16),
                                       g2, b2, m2, v2, cw2,
                                       compute_dtype=jnp.bfloat16)
    out3 = jax.block_until_ready(out3)
    assert out3.dtype == jnp.bfloat16
    assert jnp.allclose(out3.astype(jnp.float32), ref2, atol=1e-1, rtol=1e-1), \
        float(jnp.max(jnp.abs(out3.astype(jnp.float32) - ref2)))

    print("KERNEL_OK")
</pallas_src>

<mosaic_0001>
module attributes {stable_mosaic.version = 11 : i64} {
  func.func @_xdens_transition_kernel(%arg0: i32, %arg1: i32, %arg2: memref<1x2x2x8x8xf32, #tpu.memory_space<vmem>>, %arg3: memref<1x8xf32, #tpu.memory_space<vmem>>, %arg4: memref<1x8xf32, #tpu.memory_space<vmem>>, %arg5: memref<4x8xf32, #tpu.memory_space<vmem>>, %arg6: memref<1x2x8x8xf32, #tpu.memory_space<vmem>>) attributes {dimension_semantics = [#tpu.dimension_semantics<parallel>, #tpu.dimension_semantics<parallel>], iteration_bounds = array<i64: 2, 4>, scalar_prefetch = 0 : i64, scratch_operands = 0 : i64, tpu.core_type = #tpu.core_type<tc>, window_params = [{transform_indices = @transform_0, window_bounds = array<i64: 1, 2, 2, 8, 8>}, {pipeline_mode = #tpu.pipeline_mode<synchronous>, transform_indices = @transform_1, window_bounds = array<i64: 1, 8>}, {pipeline_mode = #tpu.pipeline_mode<synchronous>, transform_indices = @transform_2, window_bounds = array<i64: 1, 8>}, {pipeline_mode = #tpu.pipeline_mode<synchronous>, transform_indices = @transform_3, window_bounds = array<i64: 4, 8>}, {transform_indices = @transform_4, window_bounds = array<i64: 1, 2, 8, 8>}]} {
    %c0 = arith.constant 0 : index
    %c0_0 = arith.constant 0 : index
    %0 = vector.load %arg3[%c0, %c0_0] : memref<1x8xf32, #tpu.memory_space<vmem>>, vector<1x8xf32>
    %c0_1 = arith.constant 0 : index
    %c0_2 = arith.constant 0 : index
    %1 = vector.load %arg4[%c0_1, %c0_2] : memref<1x8xf32, #tpu.memory_space<vmem>>, vector<1x8xf32>
    %c0_3 = arith.constant 0 : index
    %c0_4 = arith.constant 0 : index
    %c0_5 = arith.constant 0 : index
    %c0_6 = arith.constant 0 : index
    %c0_7 = arith.constant 0 : index
    %2 = vector.load %arg2[%c0_3, %c0_4, %c0_5, %c0_6, %c0_7] : memref<1x2x2x8x8xf32, #tpu.memory_space<vmem>>, vector<1x2x2x8x8xf32>
    %3 = vector.shape_cast %2 : vector<1x2x2x8x8xf32> to vector<2x2x8x8xf32>
    %4 = vector.extract_strided_slice %3 {offsets = [0, 0, 0, 0], sizes = [2, 1, 8, 8], strides = [1, 1, 1, 1]} : vector<2x2x8x8xf32> to vector<2x1x8x8xf32>
    %5 = vector.shape_cast %4 : vector<2x1x8x8xf32> to vector<2x8x8xf32>
    %6 = vector.shape_cast %0 : vector<1x8xf32> to vector<1x1x8xf32>
    %7 = vector.broadcast %6 : vector<1x1x8xf32> to vector<2x8x8xf32>
    %8 = arith.mulf %5, %7 : vector<2x8x8xf32>
    %9 = vector.shape_cast %1 : vector<1x8xf32> to vector<1x1x8xf32>
    %10 = vector.broadcast %9 : vector<1x1x8xf32> to vector<2x8x8xf32>
    %11 = arith.addf %8, %10 : vector<2x8x8xf32>
    %cst = arith.constant 0.000000e+00 : f32
    %12 = vector.broadcast %cst : f32 to vector<2x8x8xf32>
    %13 = arith.maximumf %11, %12 : vector<2x8x8xf32>
    %14 = vector.extract_strided_slice %3 {offsets = [0, 1, 0, 0], sizes = [2, 1, 8, 8], strides = [1, 1, 1, 1]} : vector<2x2x8x8xf32> to vector<2x1x8x8xf32>
    %15 = vector.shape_cast %14 : vector<2x1x8x8xf32> to vector<2x8x8xf32>
    %16 = vector.shape_cast %0 : vector<1x8xf32> to vector<1x1x8xf32>
    %17 = vector.broadcast %16 : vector<1x1x8xf32> to vector<2x8x8xf32>
    %18 = arith.mulf %15, %17 : vector<2x8x8xf32>
    %19 = vector.shape_cast %1 : vector<1x8xf32> to vector<1x1x8xf32>
    %20 = vector.broadcast %19 : vector<1x1x8xf32> to vector<2x8x8xf32>
    %21 = arith.addf %18, %20 : vector<2x8x8xf32>
    %cst_8 = arith.constant 0.000000e+00 : f32
    %22 = vector.broadcast %cst_8 : f32 to vector<2x8x8xf32>
    %23 = arith.maximumf %21, %22 : vector<2x8x8xf32>
    %24 = arith.addf %13, %23 : vector<2x8x8xf32>
    %25 = vector.extract_strided_slice %24 {offsets = [0, 0, 0], sizes = [2, 8, 4], strides = [1, 1, 1]} : vector<2x8x8xf32> to vector<2x8x4xf32>
    %26 = vector.extract_strided_slice %24 {offsets = [0, 0, 4], sizes = [2, 8, 4], strides = [1, 1, 1]} : vector<2x8x8xf32> to vector<2x8x4xf32>
    %27 = arith.addf %25, %26 : vector<2x8x4xf32>
    %28 = vector.shape_cast %27 : vector<2x8x4xf32> to vector<16x4xf32>
    %c0_9 = arith.constant 0 : index
    %c0_10 = arith.constant 0 : index
    %29 = vector.load %arg5[%c0_9, %c0_10] : memref<4x8xf32, #tpu.memory_space<vmem>>, vector<4x8xf32>
    %cst_11 = arith.constant dense<0.000000e+00> : vector<16x8xf32>
    %30 = tpu.matmul %28, %29, %cst_11 {dimension_numbers = #tpu.dot_dimension_numbers<[1], [0], [0], [1], [0, 0, 1, 1], [], []>} : vector<16x4xf32>, vector<4x8xf32>, vector<16x8xf32> -> vector<16x8xf32>
    %31 = vector.shape_cast %30 : vector<16x8xf32> to vector<2x8x8xf32>
    %c0_12 = arith.constant 0 : index
    %c0_13 = arith.constant 0 : index
    %c0_14 = arith.constant 0 : index
    %c0_15 = arith.constant 0 : index
    %32 = vector.load %arg6[%c0_12, %c0_13, %c0_14, %c0_15] : memref<1x2x8x8xf32, #tpu.memory_space<vmem>>, vector<1x2x8x8xf32>
    %33 = vector.shape_cast %32 : vector<1x2x8x8xf32> to vector<2x8x8xf32>
    %34 = vector.shape_cast %31 : vector<2x8x8xf32> to vector<1x2x8x8xf32>
    tpu.vector_store %arg6[%c0_12, %c0_13, %c0_14, %c0_15], %34 {strides = array<i32>} : memref<1x2x8x8xf32, #tpu.memory_space<vmem>>, vector<1x2x8x8xf32>,
    return
  }
  func.func @transform_0(%arg0: i32, %arg1: i32) -> (i32, i32, i32, i32, i32) {
    %c0_i32 = arith.constant 0 : i32
    %c0_i32_0 = arith.constant 0 : i32
    %c0_i32_1 = arith.constant 0 : i32
    %c0_i32_2 = arith.constant 0 : i32
    return %arg0, %arg1, %c0_i32, %c0_i32_0, %c0_i32_1 : i32, i32, i32, i32, i32
  }
  func.func @transform_1(%arg0: i32, %arg1: i32) -> (i32, i32) {
    %c0_i32 = arith.constant 0 : i32
    %c0_i32_0 = arith.constant 0 : i32
    %c0_i32_1 = arith.constant 0 : i32
    return %c0_i32, %c0_i32_0 : i32, i32
  }
  func.func @transform_2(%arg0: i32, %arg1: i32) -> (i32, i32) {
    %c0_i32 = arith.constant 0 : i32
    %c0_i32_0 = arith.constant 0 : i32
    %c0_i32_1 = arith.constant 0 : i32
    return %c0_i32, %c0_i32_0 : i32, i32
  }
  func.func @transform_3(%arg0: i32, %arg1: i32) -> (i32, i32) {
    %c0_i32 = arith.constant 0 : i32
    %c0_i32_0 = arith.constant 0 : i32
    %c0_i32_1 = arith.constant 0 : i32
    return %c0_i32, %c0_i32_0 : i32, i32
  }
  func.func @transform_4(%arg0: i32, %arg1: i32) -> (i32, i32, i32, i32) {
    %c0_i32 = arith.constant 0 : i32
    %c0_i32_0 = arith.constant 0 : i32
    %c0_i32_1 = arith.constant 0 : i32
    return %arg0, %arg1, %c0_i32, %c0_i32_0 : i32, i32, i32, i32
  }
}

module attributes {stable_mosaic.version = 11 : i64} {
  func.func @_xdens_transition_kernel(%arg0: i32, %arg1: i32, %arg2: memref<1x2x2x8x8xf32, #tpu.memory_space<vmem>>, %arg3: memref<1x8xf32, #tpu.memory_space<vmem>>, %arg4: memref<1x8xf32, #tpu.memory_space<vmem>>, %arg5: memref<4x8xf32, #tpu.memory_space<vmem>>, %arg6: memref<1x2x8x8xf32, #tpu.memory_space<vmem>>) attributes {dimension_semantics = [#tpu.dimension_semantics<parallel>, #tpu.dimension_semantics<parallel>], iteration_bounds = array<i64: 2, 4>, scalar_prefetch = 0 : i64, scratch_operands = 0 : i64, tpu.core_type = #tpu.core_type<tc>, window_params = [{transform_indices = @transform_0, window_bounds = array<i64: 1, 2, 2, 8, 8>}, {pipeline_mode = #tpu.pipeline_mode<synchronous>, transform_indices = @transform_1, window_bounds = array<i64: 1, 8>}, {pipeline_mode = #tpu.pipeline_mode<synchronous>, transform_indices = @transform_2, window_bounds = array<i64: 1, 8>}, {pipeline_mode = #tpu.pipeline_mode<synchronous>, transform_indices = @transform_3, window_bounds = array<i64: 4, 8>}, {transform_indices = @transform_4, window_bounds = array<i64: 1, 2, 8, 8>}]} {
    %c0 = arith.constant 0 : index
    %c0_0 = arith.constant 0 : index
    %0 = vector.load %arg3[%c0, %c0_0] : memref<1x8xf32, #tpu.memory_space<vmem>>, vector<1x8xf32>
    %c0_1 = arith.constant 0 : index
    %c0_2 = arith.constant 0 : index
    %1 = vector.load %arg4[%c0_1, %c0_2] : memref<1x8xf32, #tpu.memory_space<vmem>>, vector<1x8xf32>
    %c0_3 = arith.constant 0 : index
    %c0_4 = arith.constant 0 : index
    %c0_5 = arith.constant 0 : index
    %c0_6 = arith.constant 0 : index
    %c0_7 = arith.constant 0 : index
    %2 = vector.load %arg2[%c0_3, %c0_4, %c0_5, %c0_6, %c0_7] : memref<1x2x2x8x8xf32, #tpu.memory_space<vmem>>, vector<1x2x2x8x8xf32>
    %3 = vector.shape_cast %2 : vector<1x2x2x8x8xf32> to vector<2x2x8x8xf32>
    %4 = vector.extract_strided_slice %3 {offsets = [0, 0, 0, 0], sizes = [2, 1, 8, 8], strides = [1, 1, 1, 1]} : vector<2x2x8x8xf32> to vector<2x1x8x8xf32>
    %5 = vector.shape_cast %4 : vector<2x1x8x8xf32> to vector<2x8x8xf32>
    %6 = vector.shape_cast %0 : vector<1x8xf32> to vector<1x1x8xf32>
    %7 = vector.broadcast %6 : vector<1x1x8xf32> to vector<2x8x8xf32>
    %8 = arith.mulf %5, %7 : vector<2x8x8xf32>
    %9 = vector.shape_cast %1 : vector<1x8xf32> to vector<1x1x8xf32>
    %10 = vector.broadcast %9 : vector<1x1x8xf32> to vector<2x8x8xf32>
    %11 = arith.addf %8, %10 : vector<2x8x8xf32>
    %cst = arith.constant 0.000000e+00 : f32
    %12 = vector.broadcast %cst : f32 to vector<2x8x8xf32>
    %13 = arith.maximumf %11, %12 : vector<2x8x8xf32>
    %14 = vector.extract_strided_slice %3 {offsets = [0, 1, 0, 0], sizes = [2, 1, 8, 8], strides = [1, 1, 1, 1]} : vector<2x2x8x8xf32> to vector<2x1x8x8xf32>
    %15 = vector.shape_cast %14 : vector<2x1x8x8xf32> to vector<2x8x8xf32>
    %16 = vector.shape_cast %0 : vector<1x8xf32> to vector<1x1x8xf32>
    %17 = vector.broadcast %16 : vector<1x1x8xf32> to vector<2x8x8xf32>
    %18 = arith.mulf %15, %17 : vector<2x8x8xf32>
    %19 = vector.shape_cast %1 : vector<1x8xf32> to vector<1x1x8xf32>
    %20 = vector.broadcast %19 : vector<1x1x8xf32> to vector<2x8x8xf32>
    %21 = arith.addf %18, %20 : vector<2x8x8xf32>
    %cst_8 = arith.constant 0.000000e+00 : f32
    %22 = vector.broadcast %cst_8 : f32 to vector<2x8x8xf32>
    %23 = arith.maximumf %21, %22 : vector<2x8x8xf32>
    %24 = arith.addf %13, %23 : vector<2x8x8xf32>
    %25 = vector.extract_strided_slice %24 {offsets = [0, 0, 0], sizes = [2, 8, 4], strides = [1, 1, 1]} : vector<2x8x8xf32> to vector<2x8x4xf32>
    %26 = vector.extract_strided_slice %24 {offsets = [0, 0, 4], sizes = [2, 8, 4], strides = [1, 1, 1]} : vector<2x8x8xf32> to vector<2x8x4xf32>
    %27 = arith.addf %25, %26 : vector<2x8x4xf32>
    %28 = vector.shape_cast %27 : vector<2x8x4xf32> to vector<16x4xf32>
    %c0_9 = arith.constant 0 : index
    %c0_10 = arith.constant 0 : index
    %29 = vector.load %arg5[%c0_9, %c0_10] : memref<4x8xf32, #tpu.memory_space<vmem>>, vector<4x8xf32>
    %cst_11 = arith.constant dense<0.000000e+00> : vector<16x8xf32>
    %30 = tpu.matmul %28, %29, %cst_11 {dimension_numbers = #tpu.dot_dimension_numbers<[1], [0], [0], [1], [0, 0, 1, 1], [], []>} : vector<16x4xf32>, vector<4x8xf32>, vector<16x8xf32> -> vector<16x8xf32>
    %31 = vector.shape_cast %30 : vector<16x8xf32> to vector<2x8x8xf32>
    %c0_12 = arith.constant 0 : index
    %c0_13 = arith.constant 0 : index
    %c0_14 = arith.constant 0 : index
    %c0_15 = arith.constant 0 : index
    %32 = vector.load %arg6[%c0_12, %c0_13, %c0_14, %c0_15] : memref<1x2x8x8xf32, #tpu.memory_space<vmem>>, vector<1x2x8x8xf32>
    %33 = vector.shape_cast %32 : vector<1x2x8x8xf32> to vector<2x8x8xf32>
    %34 = vector.shape_cast %31 : vector<2x8x8xf32> to vector<1x2x8x8xf32>
    tpu.vector_store %arg6[%c0_12, %c0_13, %c0_14, %c0_15], %34 {strides = array<i32>} : memref<1x2x8x8xf32, #tpu.memory_space<vmem>>, vector<1x2x8x8xf32>,
    return
  }
  func.func @transform_0(%arg0: i32, %arg1: i32) -> (i32, i32, i32, i32, i32) {
    %c0_i32 = arith.constant 0 : i32
    %c0_i32_0 = arith.constant 0 : i32
    %c0_i32_1 = arith.constant 0 : i32
    %c0_i32_2 = arith.constant 0 : i32
    return %arg0, %arg1, %c0_i32, %c0_i32_0, %c0_i32_1 : i32, i32, i32, i32, i32
  }
  func.func @transform_1(%arg0: i32, %arg1: i32) -> (i32, i32) {
    %c0_i32 = arith.constant 0 : i32
    %c0_i32_0 = arith.constant 0 : i32
    %c0_i32_1 = arith.constant 0 : i32
    return %c0_i32, %c0_i32_0 : i32, i32
  }
  func.func @transform_2(%arg0: i32, %arg1: i32) -> (i32, i32) {
    %c0_i32 = arith.constant 0 : i32
    %c0_i32_0 = arith.constant 0 : i32
    %c0_i32_1 = arith.constant 0 : i32
    return %c0_i32, %c0_i32_0 : i32, i32
  }
  func.func @transform_3(%arg0: i32, %arg1: i32) -> (i32, i32) {
    %c0_i32 = arith.constant 0 : i32
    %c0_i32_0 = arith.constant 0 : i32
    %c0_i32_1 = arith.constant 0 : i32
    return %c0_i32, %c0_i32_0 : i32, i32
  }
  func.func @transform_4(%arg0: i32, %arg1: i32) -> (i32, i32, i32, i32) {
    %c0_i32 = arith.constant 0 : i32
    %c0_i32_0 = arith.constant 0 : i32
    %c0_i32_1 = arith.constant 0 : i32
    return %arg0, %arg1, %c0_i32, %c0_i32_0 : i32, i32, i32, i32
  }
}

</mosaic_0001>

<bundles_post_ra>
// kernel: tpu_custom_call.1
= control target key start
LH: loop header
LB: loop body
LE: loop exit
PB: predicated region body
PF: predicated region fallthrough
CT: control target
= control target key end

     0   :  { %s1008_s0 = inlined_call_operand.hbm [shape: f32[2,8,2,8,8], index: 0, kind: input, shape index: {}]   ;;  %s1009_s1 = inlined_call_operand.hbm [shape: f32[1,8], index: 1, kind: input, shape index: {}]   ;;  %s1010_s2 = inlined_call_operand.vmem [shape: f32[1,8], index: 2, kind: input, shape index: {}]   ;;  %s1011_s3 = inlined_call_operand.hbm [shape: f32[4,8], index: 3, kind: input, shape index: {}]   ;;  %s1012_s4 = inlined_call_operand.hbm [shape: f32[2,8,8,8], index: 4, kind: output, shape index: {}]  }
   0x1   :  { %1020 = sst [smem:[#allocation17_spill]] %s1009_s1 }
   0x2   :  { %1021 = sst [smem:[#allocation18_spill]] %s1011_s3 }
   0x3   :  { %1022 = sst [smem:[#allocation19_spill]] %s1012_s4 }
   0x4   :  { %9 = vsyncpa [#allocation3], 0 }
   0x5   :  { %11 = vsyncpa [#allocation3 + $0x1], 0 }
   0x6   :  { %12 = vsyncpa [#allocation6], 0 }
   0x7   :  { %13 = vsyncpa [#allocation4], 0 }
   0x8   :  { %15 = vsyncpa [#allocation4 + $0x1], 0  ;;  %s828_s15 = smov 0   ;;  %s830_s16 = smov 0  }
   0x9   :  { %s832_s17 = smov 0   ;;  %s834_s18 = smov 0  }
   0xa   :  { %s836_s19 = smov 0   ;;  %s838_s20 = smov 0  }
   0xb   :  { %s840_s21 = smov 0   ;;  %s842_s22 = smov 0  }
   0xc LB: > { %1023 = sst [smem:[#allocation12_spill]] %s766_s15  ;;  %s469_s23 = sadd.s32 4294967295, %s794_s22   ;;  %s794_s22 = sphi %s842_s22, %s1049_s22   ;;  %s790_s21 = sphi %s840_s21, %s1048_s21   ;;  %s786_s20 = sphi %s838_s20, %s1043_s20   ;;  %s782_s19 = sphi %s836_s19, %s1047_s19   ;;  %s778_s18 = sphi %s834_s18, %s1042_s18   ;;  %s774_s17 = sphi %s832_s17, %s1046_s17   ;;  %s770_s16 = sphi %s830_s16, %s1045_s16   ;;  %s766_s15 = sphi %s828_s15, %s1044_s15  }
   0xd   : > { %1024 = sst [smem:[#allocation13_spill]] %s786_s20  ;;  %s470_s24 = sadd.s32 4294967294, %s794_s22  }
   0xe   : > { %1025 = sst [smem:[#allocation14_spill]] %s794_s22  ;;  %p49_p0 = scmp.ne.s32.totalorder %s774_s17, %s770_s16 }
   0xf   : > { %p50_p1 = scmp.eq.s32.totalorder %s794_s22, 0  ;;  %p55_p2 = scmp.ne.s32.totalorder %s770_s16, %s766_s15 }
  0x10   : > { %p876_p3 = scmp.eq.s32.totalorder %s469_s23, 0  ;;  %p144_p4 = scmp.eq.s32.totalorder %s469_s23, 7 }
  0x11   : > { %p880_p5 = por %p50_p1, %p49_p0  ;;  %p150_p6 = scmp.eq.s32.totalorder %s470_s24, 7 }
  0x12   : > { %p886_p7 = por %p876_p3, %p55_p2  ;;  %p890_p8 = por %p144_p4, %p49_p0 }
  0x13   : > { %p894_p9 = por %p150_p6, %p55_p2  ;;  %p471_p10 = scmp.ge.s32.totalorder %s794_s22, 1 }
  0x14   : > { %p157_p11 = scmp.lt.s32.totalorder %s794_s22, 9  ;;  %s1032_s1 = sld [smem:[#allocation17_spill]] }
  0x15   : > { %s1030_s30 = scalar_select %p894_p9, 1, 0 }
  0x16   : > { %p903_p12 = pnand %p471_p10, %p157_p11  ;;  %s796_s9 = smov [#allocation5]  }
  0x17   : > { %1031 = sst [smem:[#allocation15_spill]] %s1030_s30  ;;  %s171_s10 = sshll.u32 %s796_s9, 4  ;;  %s172_s10 = int_to_ptr.vmem [resolvable:$true] %s171_s10 }
  0x18   : > { %p508_p13 = pneg %p903_p12  ;;  %p525_p0 = scmp.lt.s32.totalorder %s794_s22, 8 }
  0x19   : > { %s1034_s3 = sld [smem:[#allocation18_spill]]  ;;  %s797_s23 = smov [#allocation7]  }
  0x1a   : > { %s169_s7 = sshll.u32 %s1032_s1, 4  ;;  %p509_p1 = pnand %p508_p13, %p876_p3  ;;  %s170_s7 = int_to_ptr.hbm [resolvable:$true] %s169_s7 }
  0x1b   : > { %p917_p2 = pnand %p525_p0, %p880_p5  ;;  %s186_s24 = sshll.u32 %s797_s23, 4  ;;  %s187_s24 = int_to_ptr.vmem [resolvable:$true] %s186_s24 }
  0x1c   : > { %511 = dma.hbm_to_vmem [thread:$0]  (!%p509_p1), %s170_s7, 16, %s172_s10, [#allocation6]  }
  0x1d   : > { %s30_s5 = sadd.s32 1, %s786_s20  ;;  %s33_s6 = sadd.s32 1, %s790_s21 }
  0x1e   : > { %p31_p4 = scmp.ge.s32.totalorder %s30_s5, 4  ;;  %s197_s9 = sand.u32 1, %s774_s17  }
  0x1f   : > { %s184_s13 = sshll.u32 %s1034_s3, 4  ;;  %s475_s11 = sshll.u32 %s197_s9, 5  ;;  %s185_s13 = int_to_ptr.hbm [resolvable:$true] %s184_s13 }
  0x20   : > { %514 = dma.hbm_to_vmem [thread:$0]  (!%p509_p1), %s185_s13, 64, %s187_s24, [#allocation6]  }
  0x21   : > { %s1051_s5 = smov (%p31_p4, %s30_s5), 0  ;;  %s1053_s6 = smov (!%p31_p4, %s33_s6), %s790_s21 }
  0x22   : > { %1036 = sst [smem:[#allocation16_spill]] %s1051_s5  ;;  %s38_s27 = ssub.s32 %s786_s20, %s1051_s5 }
  0x23   : > { %p35_p5 = scmp.ge.s32.totalorder %s1053_s6, 2  ;;  %s494_s12 = sshll.u32 %s786_s20, 2 }
  0x24   : > { %s478_s25 = sshll.u32 %s790_s21, 4  ;;  %s201_s23 = scalar_lea.vmem [#allocation2], %s475_s11 }
  0x25   : > { %s212_s7 = sshll.u32 %s201_s23, 4  ;;  %s1055_s6 = smov (%p35_p5, %s1053_s6), 0  ;;  %s213_s7 = int_to_ptr.vmem [resolvable:$true] %s212_s7 }
  0x26   : > { %s207_s10 = sadd.s32 %s494_s12, %s478_s25  ;;  %s37_s13 = ssub.s32 %s790_s21, %s1055_s6 }
  0x27   : > { %s479_s24 = sshll.u32 %s207_s10, 3  ;;  %s39_s1 = sor.u32 %s38_s27, %s37_s13 }
  0x28   : > { %s209_s5 = scalar_lea.hbm %s1008_s0, %s479_s24  ;;  %p40_p6 = scmp.eq.s32.totalorder %s39_s1, 0 }
  0x29   : > { %s210_s15 = sshll.u32 %s209_s5, 4  ;;  %s1037_s20 = sadd.s32 1, %s774_s17  ;;  %s211_s15 = int_to_ptr.hbm [resolvable:$true] %s210_s15 }
  0x2a   : > { %s941_s22 = scalar_select %p40_p6, %s774_s17, %s1037_s20  }
  0x2b   : > { %s198_s11 = scalar_lea.sflag [#allocation3], %s197_s9  ;;  %s798_s23 = smov 128  }
  0x2c   : > { %s799_s4 = smov 8   ;;  %224 = sbr.rel (%p903_p12) target bundleno = 317 (0x13d), region = 36 }
  0x2d   : > { %518 = dma.hbm_to_vmem [thread:$0]  (!%p917_p2), %s211_s15, 512, %s213_s7, %s198_s11, %s798_s23, %s798_s23, %s799_s4  }
  0x2e   : > { %s948_s25 = sand.u32 (!%p903_p12), 1, %s770_s16  }
  0x2f   : > { %s481_s1 = sshll.u32 (!%p903_p12), %s948_s25, 5  ;;  %s227_s3 = scalar_lea.sflag (!%p903_p12), [#allocation3], %s948_s25 }
  0x30   : > { %s230_s30 = scalar_lea.vmem (!%p903_p12), [#allocation2], %s481_s1 }
  0x31   : > { %753 = dma.done.wait (%p886_p7), %s227_s3, 512  }
  0x32   : > { %755 = vsyncadd (%p886_p7), %s227_s3, 4294966784 }
  0x33   : > { %757 = dma.done.wait (%p876_p3), [#allocation6], 80  }
  0x34   : > { %759 = vsyncadd (%p876_p3), [#allocation6], 4294967216  ;;  %v270_v0 = vld [vmem:[%s230_s30] sm:$0xff]  ;;  %v271_v1 = vld [vmem:[%s230_s30 + $0x8] sm:$0xff]  ;;  %s800_s20 = smov 124   ;;  %vm312_vm0 = vcmask 1043456  }
  0x35   : > { %v600_v2 = vld [vmem:[#allocation5] ss:$0 sm:$0xff]  ;;  %v272_v4 = vld [vmem:[%s230_s30 + $0x10] sm:$0xff]  ;;  %v273_v5 = vld [vmem:[%s230_s30 + $0x18] sm:$0xff]  ;;  %vm305_vm1 = vcmask 31744   ;;  %s489_s26 = sshll.u32 %s778_s18, 1 }
  0x36   : > { %v601_v3 = vld [vmem:[%s1010_s2] ss:$0 sm:$0xff]  ;;  %v277_v6 = vmul.f32 %v600_v2, %v270_v0  ;;  %v286_v7 = vmul.f32 %v600_v2, %v271_v1  ;;  %v278_v8 = vmul.f32 %v600_v2, %v272_v4  ;;  %v287_v9 = vmul.f32 %v600_v2, %v273_v5  ;;  %v304_v20 = vld [vmem:[#allocation7] sm:$0xf]  ;;  %s490_s28 = sshll.u32 %s782_s19, 3  ;;  %s484_s14 = sshll.u32 %s948_s25, 4 }
  0x37   : > { %485 = vmatpush.msk.msra.mxu0 %vm312_vm0, %v304_v20  ;;  %495 = vmatpush.msk.msra.mxu1 %vm312_vm0, %v304_v20  ;;  %s354_s8 = sadd.s32 %s490_s28, %s489_s26  ;;  %vm339_vm2 = vcmask 64512   ;;  %s1038_s12 = sld [smem:[#allocation19_spill]] }
  0x38   : > { %v282_v10 = vadd.f32 %v601_v3, %v277_v6  ;;  %v288_v11 = vadd.f32 %v601_v3, %v286_v7  ;;  %v283_v14 = vadd.f32 %v601_v3, %v278_v8  ;;  %v289_v15 = vadd.f32 %v601_v3, %v287_v9  ;;  %s491_s5 = sshll.u32 %s354_s8, 3  ;;  %s265_s10 = scalar_lea.vmem [#allocation8], %s484_s14 }
  0x39   : > { %s357_s13 = sshll.u32 %s265_s10, 4  ;;  %s343_s18 = scalar_lea.sflag [#allocation4], %s948_s25  ;;  %s358_s13 = int_to_ptr.vmem [resolvable:$true] %s357_s13 }
  0x3a   : > { %v284_v12 = vmax.f32 %v282_v10, 0.0  ;;  %v290_v13 = vmax.f32 %v288_v11, 0.0  ;;  %v285_v17 = vmax.f32 %v283_v14, 0.0  ;;  %v291_v18 = vmax.f32 %v289_v15, 0.0 }
  0x3c   : > { %v292_v16 = vadd.f32 %v290_v13, %v284_v12  ;;  %v293_v19 = vadd.f32 %v291_v18, %v285_v17 }
  0x3d   : > { %s356_s7 = scalar_lea.hbm %s1038_s12, %s491_s5  ;;  %s712_s3 = scalar_lea.hbm %s1038_s12, 128 }
  0x3e   : > { %296 = vrot.lane.b32.xlu0 %v292_v16, %s800_s20  ;;  %s359_s24 = sshll.u32 %s356_s7, 4  ;;  %s360_s24 = int_to_ptr.hbm [resolvable:$true] %s359_s24 }
  0x3f   : > { %s706_s19 = sshra.s32 %s360_s24, 4  ;;  %s707_s19 = int_to_ptr.hbm [resolvable:$true] %s706_s19 }
  0x40   : > { %s708_s11 = scalar_lea.hbm %s707_s19, 16  ;;  %p713_p11 = scmp.lt.s32.totalorder %s707_s19, %s1038_s12 }
  0x41   : > { %p709_p3 = scmp.ne.s32.totalorder %s707_s19, %s708_s11  ;;  %p714_p12 = scmp.lt.s32.totalorder %s712_s3, %s708_s11 }
  0x43   : > { %p710_p7 = pnand %p709_p3, %p890_p8  ;;  %p715_p13 = por %p714_p12, %p713_p11 }
  0x45   : > { %p711_p10 = pneg %p710_p7 }
  0x46   : > { %298 = vrot.lane.b32.xlu0 %v293_v19, %s800_s20 }
  0x47   : > { %p716_p0 = pnand %p715_p13, %p711_p10 }
  0xb0   : > { %v297_v21 = vpop.permute.xlu0 %296 }
  0xb1   : > { %v302_v22 = vadd.f32 %v297_v21, %v292_v16 }
  0xb3   : > { %486 = vmatmul.msk.f32.vlgmr.msra.gmra.mxu0 %vm305_vm1, %v302_v22 }
  0xb8   : > { %v299_v23 = vpop.permute.xlu0 %298 }
  0xb9   : > { %v303_v24 = vadd.f32 %v299_v23, %v293_v19 }
  0xbb   : > { %487 = vmatmul.msk.f32.vlgmr.msra.gmra.mxu1 %vm305_vm1, %v303_v24 }
 0x130   : > { %v333_v25 = vpop.f32.mrf.mxu0 }
 0x131   : > { %340 = vst.msk [vmem:[%s265_s10] sm:$0xff] %vm339_vm2, %v333_v25 }
 0x138   : > { %v336_v26 = vpop.f32.mrf.mxu1 }
 0x139   : > { %341 = vst.msk [vmem:[%s265_s10 + $0x8] sm:$0xff] %vm339_vm2, %v336_v26 }
 0x13a   : > { %719 = shalt.err (!%p716_p0)
}
 0x13b   : > { %s801_s25 = smov 128   ;;  %s802_s15 = smov 8  }
 0x13c   : > { %506 = dma.vmem_to_hbm [thread:$0]  (%p890_p8), %s358_s13, 256, %s360_s24, %s343_s18, %s801_s25, %s801_s25, %s802_s15  }
 0x13d PF: > { %s1039_s20 = sld [smem:[#allocation14_spill]] }
 0x13e   : > { %s1040_s26 = sld [smem:[#allocation12_spill]] }
 0x143   : > { %p528_p1 = scmp.ge.s32.totalorder %s1039_s20, 2 }
 0x144   : > { %s374_s8 = sand.u32 1, %s1040_s26  }
 0x145   : > { %p520_p2 = pnand %p528_p1, %p894_p9  ;;  %s375_s14 = scalar_lea.sflag [#allocation4], %s374_s8 }
 0x147   : > { %p521_p4 = pneg %p520_p2 }
 0x149   : > { %761 = dma.done.wait (%p521_p4), %s375_s14, 256  }
 0x14a   : > { %763 = vsyncadd (%p521_p4), %s375_s14, 4294967040  ;;  %s21_s5 = sadd.s32 1, %s1039_s20   ;;  %s1042_s18 = sld [smem:[#allocation13_spill]] }
 0x14b   : > { %p18_p5 = scmp.ge.s32.totalorder %s21_s5, 10   ;;  %s1043_s20 = sld [smem:[#allocation16_spill]] }
 0x14c   : > { %s1044_s15 = smov %s770_s16  ;;  %s1045_s16 = smov %s774_s17 }
 0x14d   : > { %s1046_s17 = smov %s941_s22  ;;  %s1047_s19 = smov %s790_s21 }
 0x14e   : > { %s1048_s21 = smov %s1055_s6  ;;  %s1049_s22 = smov %s21_s5 }
 0x14f   :  { %20 = sbr.rel (!%p18_p5) target bundleno = 12 (0xc), region = 89 }
 0x154   :  { %381 = vsyncpa [#allocation3], 1 }
 0x155   :  { %383 = vsyncpa [#allocation3 + $0x1], 1 }
 0x156   :  { %384 = vsyncpa [#allocation6], 1 }
 0x157   :  { %385 = vsyncpa [#allocation4], 1 }
 0x158   :  { %387 = vsyncpa [#allocation4 + $0x1], 1 }

// kernel: tpu_custom_call.1
= control target key start
LH: loop header
LB: loop body
LE: loop exit
PB: predicated region body
PF: predicated region fallthrough
CT: control target
= control target key end

     0   :  { %s1008_s0 = inlined_call_operand.hbm [shape: f32[2,8,2,8,8], index: 0, kind: input, shape index: {}]   ;;  %s1009_s1 = inlined_call_operand.hbm [shape: f32[1,8], index: 1, kind: input, shape index: {}]   ;;  %s1010_s2 = inlined_call_operand.vmem [shape: f32[1,8], index: 2, kind: input, shape index: {}]   ;;  %s1011_s3 = inlined_call_operand.hbm [shape: f32[4,8], index: 3, kind: input, shape index: {}]   ;;  %s1012_s4 = inlined_call_operand.hbm [shape: f32[2,8,8,8], index: 4, kind: output, shape index: {}]  }
   0x1   :  { %1020 = sst [smem:[#allocation17_spill]] %s1009_s1 }
   0x2   :  { %1021 = sst [smem:[#allocation18_spill]] %s1011_s3 }
   0x3   :  { %1022 = sst [smem:[#allocation19_spill]] %s1012_s4 }
   0x4   :  { %9 = vsyncpa [#allocation3], 0 }
   0x5   :  { %11 = vsyncpa [#allocation3 + $0x1], 0 }
   0x6   :  { %12 = vsyncpa [#allocation6], 0 }
   0x7   :  { %13 = vsyncpa [#allocation4], 0 }
   0x8   :  { %15 = vsyncpa [#allocation4 + $0x1], 0  ;;  %s828_s15 = smov 0   ;;  %s830_s16 = smov 0  }
   0x9   :  { %s832_s17 = smov 0   ;;  %s834_s18 = smov 0  }
   0xa   :  { %s836_s19 = smov 0   ;;  %s838_s20 = smov 0  }
   0xb   :  { %s840_s21 = smov 0   ;;  %s842_s22 = smov 0  }
   0xc LB: > { %1023 = sst [smem:[#allocation12_spill]] %s766_s15  ;;  %s469_s23 = sadd.s32 4294967295, %s794_s22   ;;  %s794_s22 = sphi %s842_s22, %s1049_s22   ;;  %s790_s21 = sphi %s840_s21, %s1048_s21   ;;  %s786_s20 = sphi %s838_s20, %s1043_s20   ;;  %s782_s19 = sphi %s836_s19, %s1047_s19   ;;  %s778_s18 = sphi %s834_s18, %s1042_s18   ;;  %s774_s17 = sphi %s832_s17, %s1046_s17   ;;  %s770_s16 = sphi %s830_s16, %s1045_s16   ;;  %s766_s15 = sphi %s828_s15, %s1044_s15  }
   0xd   : > { %1024 = sst [smem:[#allocation13_spill]] %s786_s20  ;;  %s470_s24 = sadd.s32 4294967294, %s794_s22  }
   0xe   : > { %1025 = sst [smem:[#allocation14_spill]] %s794_s22  ;;  %p49_p0 = scmp.ne.s32.totalorder %s774_s17, %s770_s16 }
   0xf   : > { %p50_p1 = scmp.eq.s32.totalorder %s794_s22, 0  ;;  %p55_p2 = scmp.ne.s32.totalorder %s770_s16, %s766_s15 }
  0x10   : > { %p876_p3 = scmp.eq.s32.totalorder %s469_s23, 0  ;;  %p144_p4 = scmp.eq.s32.totalorder %s469_s23, 7 }
  0x11   : > { %p880_p5 = por %p50_p1, %p49_p0  ;;  %p150_p6 = scmp.eq.s32.totalorder %s470_s24, 7 }
  0x12   : > { %p886_p7 = por %p876_p3, %p55_p2  ;;  %p890_p8 = por %p144_p4, %p49_p0 }
  0x13   : > { %p894_p9 = por %p150_p6, %p55_p2  ;;  %p471_p10 = scmp.ge.s32.totalorder %s794_s22, 1 }
  0x14   : > { %p157_p11 = scmp.lt.s32.totalorder %s794_s22, 9  ;;  %s1032_s1 = sld [smem:[#allocation17_spill]] }
  0x15   : > { %s1030_s30 = scalar_select %p894_p9, 1, 0 }
  0x16   : > { %p903_p12 = pnand %p471_p10, %p157_p11  ;;  %s796_s9 = smov [#allocation5]  }
  0x17   : > { %1031 = sst [smem:[#allocation15_spill]] %s1030_s30  ;;  %s171_s10 = sshll.u32 %s796_s9, 4  ;;  %s172_s10 = int_to_ptr.vmem [resolvable:$true] %s171_s10 }
  0x18   : > { %p508_p13 = pneg %p903_p12  ;;  %p525_p0 = scmp.lt.s32.totalorder %s794_s22, 8 }
  0x19   : > { %s1034_s3 = sld [smem:[#allocation18_spill]]  ;;  %s797_s23 = smov [#allocation7]  }
  0x1a   : > { %s169_s7 = sshll.u32 %s1032_s1, 4  ;;  %p509_p1 = pnand %p508_p13, %p876_p3  ;;  %s170_s7 = int_to_ptr.hbm [resolvable:$true] %s169_s7 }
  0x1b   : > { %p917_p2 = pnand %p525_p0, %p880_p5  ;;  %s186_s24 = sshll.u32 %s797_s23, 4  ;;  %s187_s24 = int_to_ptr.vmem [resolvable:$true] %s186_s24 }
  0x1c   : > { %511 = dma.hbm_to_vmem [thread:$0]  (!%p509_p1), %s170_s7, 16, %s172_s10, [#allocation6]  }
  0x1d   : > { %s30_s5 = sadd.s32 1, %s786_s20  ;;  %s33_s6 = sadd.s32 1, %s790_s21 }
  0x1e   : > { %p31_p4 = scmp.ge.s32.totalorder %s30_s5, 4  ;;  %s197_s9 = sand.u32 1, %s774_s17  }
  0x1f   : > { %s184_s13 = sshll.u32 %s1034_s3, 4  ;;  %s475_s11 = sshll.u32 %s197_s9, 5  ;;  %s185_s13 = int_to_ptr.hbm [resolvable:$true] %s184_s13 }
  0x20   : > { %514 = dma.hbm_to_vmem [thread:$0]  (!%p509_p1), %s185_s13, 64, %s187_s24, [#allocation6]  }
  0x21   : > { %s1051_s5 = smov (%p31_p4, %s30_s5), 0  ;;  %s1053_s6 = smov (!%p31_p4, %s33_s6), %s790_s21 }
  0x22   : > { %1036 = sst [smem:[#allocation16_spill]] %s1051_s5  ;;  %s38_s27 = ssub.s32 %s786_s20, %s1051_s5 }
  0x23   : > { %p35_p5 = scmp.ge.s32.totalorder %s1053_s6, 2  ;;  %s494_s12 = sshll.u32 %s786_s20, 2 }
  0x24   : > { %s478_s25 = sshll.u32 %s790_s21, 4  ;;  %s201_s23 = scalar_lea.vmem [#allocation2], %s475_s11 }
  0x25   : > { %s212_s7 = sshll.u32 %s201_s23, 4  ;;  %s1055_s6 = smov (%p35_p5, %s1053_s6), 0  ;;  %s213_s7 = int_to_ptr.vmem [resolvable:$true] %s212_s7 }
  0x26   : > { %s207_s10 = sadd.s32 %s494_s12, %s478_s25  ;;  %s37_s13 = ssub.s32 %s790_s21, %s1055_s6 }
  0x27   : > { %s479_s24 = sshll.u32 %s207_s10, 3  ;;  %s39_s1 = sor.u32 %s38_s27, %s37_s13 }
  0x28   : > { %s209_s5 = scalar_lea.hbm %s1008_s0, %s479_s24  ;;  %p40_p6 = scmp.eq.s32.totalorder %s39_s1, 0 }
  0x29   : > { %s210_s15 = sshll.u32 %s209_s5, 4  ;;  %s1037_s20 = sadd.s32 1, %s774_s17  ;;  %s211_s15 = int_to_ptr.hbm [resolvable:$true] %s210_s15 }
  0x2a   : > { %s941_s22 = scalar_select %p40_p6, %s774_s17, %s1037_s20  }
  0x2b   : > { %s198_s11 = scalar_lea.sflag [#allocation3], %s197_s9  ;;  %s798_s23 = smov 128  }
  0x2c   : > { %s799_s4 = smov 8   ;;  %224 = sbr.rel (%p903_p12) target bundleno = 317 (0x13d), region = 36 }
  0x2d   : > { %518 = dma.hbm_to_vmem [thread:$0]  (!%p917_p2), %s211_s15, 512, %s213_s7, %s198_s11, %s798_s23, %s798_s23, %s799_s4  }
  0x2e   : > { %s948_s25 = sand.u32 (!%p903_p12), 1, %s770_s16  }
  0x2f   : > { %s481_s1 = sshll.u32 (!%p903_p12), %s948_s25, 5  ;;  %s227_s3 = scalar_lea.sflag (!%p903_p12), [#allocation3], %s948_s25 }
  0x30   : > { %s230_s30 = scalar_lea.vmem (!%p903_p12), [#allocation2], %s481_s1 }
  0x31   : > { %753 = dma.done.wait (%p886_p7), %s227_s3, 512  }
  0x32   : > { %755 = vsyncadd (%p886_p7), %s227_s3, 4294966784 }
  0x33   : > { %757 = dma.done.wait (%p876_p3), [#allocation6], 80  }
  0x34   : > { %759 = vsyncadd (%p876_p3), [#allocation6], 4294967216  ;;  %v270_v0 = vld [vmem:[%s230_s30] sm:$0xff]  ;;  %v271_v1 = vld [vmem:[%s230_s30 + $0x8] sm:$0xff]  ;;  %s800_s20 = smov 124   ;;  %vm312_vm0 = vcmask 1043456  }
  0x35   : > { %v600_v2 = vld [vmem:[#allocation5] ss:$0 sm:$0xff]  ;;  %v272_v4 = vld [vmem:[%s230_s30 + $0x10] sm:$0xff]  ;;  %v273_v5 = vld [vmem:[%s230_s30 + $0x18] sm:$0xff]  ;;  %vm305_vm1 = vcmask 31744   ;;  %s489_s26 = sshll.u32 %s778_s18, 1 }
  0x36   : > { %v601_v3 = vld [vmem:[%s1010_s2] ss:$0 sm:$0xff]  ;;  %v277_v6 = vmul.f32 %v600_v2, %v270_v0  ;;  %v286_v7 = vmul.f32 %v600_v2, %v271_v1  ;;  %v278_v8 = vmul.f32 %v600_v2, %v272_v4  ;;  %v287_v9 = vmul.f32 %v600_v2, %v273_v5  ;;  %v304_v20 = vld [vmem:[#allocation7] sm:$0xf]  ;;  %s490_s28 = sshll.u32 %s782_s19, 3  ;;  %s484_s14 = sshll.u32 %s948_s25, 4 }
  0x37   : > { %485 = vmatpush.msk.msra.mxu0 %vm312_vm0, %v304_v20  ;;  %495 = vmatpush.msk.msra.mxu1 %vm312_vm0, %v304_v20  ;;  %s354_s8 = sadd.s32 %s490_s28, %s489_s26  ;;  %vm339_vm2 = vcmask 64512   ;;  %s1038_s12 = sld [smem:[#allocation19_spill]] }
  0x38   : > { %v282_v10 = vadd.f32 %v601_v3, %v277_v6  ;;  %v288_v11 = vadd.f32 %v601_v3, %v286_v7  ;;  %v283_v14 = vadd.f32 %v601_v3, %v278_v8  ;;  %v289_v15 = vadd.f32 %v601_v3, %v287_v9  ;;  %s491_s5 = sshll.u32 %s354_s8, 3  ;;  %s265_s10 = scalar_lea.vmem [#allocation8], %s484_s14 }
  0x39   : > { %s357_s13 = sshll.u32 %s265_s10, 4  ;;  %s343_s18 = scalar_lea.sflag [#allocation4], %s948_s25  ;;  %s358_s13 = int_to_ptr.vmem [resolvable:$true] %s357_s13 }
  0x3a   : > { %v284_v12 = vmax.f32 %v282_v10, 0.0  ;;  %v290_v13 = vmax.f32 %v288_v11, 0.0  ;;  %v285_v17 = vmax.f32 %v283_v14, 0.0  ;;  %v291_v18 = vmax.f32 %v289_v15, 0.0 }
  0x3c   : > { %v292_v16 = vadd.f32 %v290_v13, %v284_v12  ;;  %v293_v19 = vadd.f32 %v291_v18, %v285_v17 }
  0x3d   : > { %s356_s7 = scalar_lea.hbm %s1038_s12, %s491_s5  ;;  %s712_s3 = scalar_lea.hbm %s1038_s12, 128 }
  0x3e   : > { %296 = vrot.lane.b32.xlu0 %v292_v16, %s800_s20  ;;  %s359_s24 = sshll.u32 %s356_s7, 4  ;;  %s360_s24 = int_to_ptr.hbm [resolvable:$true] %s359_s24 }
  0x3f   : > { %s706_s19 = sshra.s32 %s360_s24, 4  ;;  %s707_s19 = int_to_ptr.hbm [resolvable:$true] %s706_s19 }
  0x40   : > { %s708_s11 = scalar_lea.hbm %s707_s19, 16  ;;  %p713_p11 = scmp.lt.s32.totalorder %s707_s19, %s1038_s12 }
  0x41   : > { %p709_p3 = scmp.ne.s32.totalorder %s707_s19, %s708_s11  ;;  %p714_p12 = scmp.lt.s32.totalorder %s712_s3, %s708_s11 }
  0x43   : > { %p710_p7 = pnand %p709_p3, %p890_p8  ;;  %p715_p13 = por %p714_p12, %p713_p11 }
  0x45   : > { %p711_p10 = pneg %p710_p7 }
  0x46   : > { %298 = vrot.lane.b32.xlu0 %v293_v19, %s800_s20 }
  0x47   : > { %p716_p0 = pnand %p715_p13, %p711_p10 }
  0xb0   : > { %v297_v21 = vpop.permute.xlu0 %296 }
  0xb1   : > { %v302_v22 = vadd.f32 %v297_v21, %v292_v16 }
  0xb3   : > { %486 = vmatmul.msk.f32.vlgmr.msra.gmra.mxu0 %vm305_vm1, %v302_v22 }
  0xb8   : > { %v299_v23 = vpop.permute.xlu0 %298 }
  0xb9   : > { %v303_v24 = vadd.f32 %v299_v23, %v293_v19 }
  0xbb   : > { %487 = vmatmul.msk.f32.vlgmr.msra.gmra.mxu1 %vm305_vm1, %v303_v24 }
 0x130   : > { %v333_v25 = vpop.f32.mrf.mxu0 }
 0x131   : > { %340 = vst.msk [vmem:[%s265_s10] sm:$0xff] %vm339_vm2, %v333_v25 }
 0x138   : > { %v336_v26 = vpop.f32.mrf.mxu1 }
 0x139   : > { %341 = vst.msk [vmem:[%s265_s10 + $0x8] sm:$0xff] %vm339_vm2, %v336_v26 }
 0x13a   : > { %719 = shalt.err (!%p716_p0)
}
 0x13b   : > { %s801_s25 = smov 128   ;;  %s802_s15 = smov 8  }
 0x13c   : > { %506 = dma.vmem_to_hbm [thread:$0]  (%p890_p8), %s358_s13, 256, %s360_s24, %s343_s18, %s801_s25, %s801_s25, %s802_s15  }
 0x13d PF: > { %s1039_s20 = sld [smem:[#allocation14_spill]] }
 0x13e   : > { %s1040_s26 = sld [smem:[#allocation12_spill]] }
 0x143   : > { %p528_p1 = scmp.ge.s32.totalorder %s1039_s20, 2 }
 0x144   : > { %s374_s8 = sand.u32 1, %s1040_s26  }
 0x145   : > { %p520_p2 = pnand %p528_p1, %p894_p9  ;;  %s375_s14 = scalar_lea.sflag [#allocation4], %s374_s8 }
 0x147   : > { %p521_p4 = pneg %p520_p2 }
 0x149   : > { %761 = dma.done.wait (%p521_p4), %s375_s14, 256  }
 0x14a   : > { %763 = vsyncadd (%p521_p4), %s375_s14, 4294967040  ;;  %s21_s5 = sadd.s32 1, %s1039_s20   ;;  %s1042_s18 = sld [smem:[#allocation13_spill]] }
 0x14b   : > { %p18_p5 = scmp.ge.s32.totalorder %s21_s5, 10   ;;  %s1043_s20 = sld [smem:[#allocation16_spill]] }
 0x14c   : > { %s1044_s15 = smov %s770_s16  ;;  %s1045_s16 = smov %s774_s17 }
 0x14d   : > { %s1046_s17 = smov %s941_s22  ;;  %s1047_s19 = smov %s790_s21 }
 0x14e   : > { %s1048_s21 = smov %s1055_s6  ;;  %s1049_s22 = smov %s21_s5 }
 0x14f   :  { %20 = sbr.rel (!%p18_p5) target bundleno = 12 (0xc), region = 89 }
 0x154   :  { %381 = vsyncpa [#allocation3], 1 }
 0x155   :  { %383 = vsyncpa [#allocation3 + $0x1], 1 }
 0x156   :  { %384 = vsyncpa [#allocation6], 1 }
 0x157   :  { %385 = vsyncpa [#allocation4], 1 }
 0x158   :  { %387 = vsyncpa [#allocation4 + $0x1], 1 }

</bundles_post_ra>
